<compile_context>
chip_gen: v7x
topology: tpu7x:2x2x1
jax: 0.10.0
libtpu: 0.0.40
codegen_flags: <defaults>
</compile_context>

<pallas_src>
import functools

import jax
import jax.numpy as jnp
from jax.experimental import pallas as pl
from jax.experimental.pallas import tpu as pltpu

LANE = 128  # hardware lane width; output/hidden feature dims are padded to this


def _round_up(x, m):
    return (x + m - 1) // m * m


def deepseqnet_kernel(x_txt_ref, x_num_ref,
                      w1_ref, b1_ref, w2_ref, b2_ref,
                      wfc_txt_ref, wfc_num_ref, bfc_ref,
                      out_ref):
    # --- num_net_forward: for linear in linear_layers: x = activation(linear(x)) ---
    # bf16 MXU matmuls with f32 accumulation; bias add / ReLU stay in f32 (v5e-safe).
    x_num = x_num_ref[...].astype(jnp.bfloat16)          # in-kernel cast, no HBM copy
    h = jnp.dot(x_num, w1_ref[...], preferred_element_type=jnp.float32)
    h = jnp.maximum(h + b1_ref[...], 0.0)
    h = jnp.dot(h.astype(jnp.bfloat16), w2_ref[...], preferred_element_type=jnp.float32)
    h = jnp.maximum(h + b2_ref[...], 0.0)

    # --- txt_net_forward ---
    # TODO(synk): txt_net_forward raises NotImplementedError in the base class; x_txt is
    # treated here as already-extracted text features (identity text net).
    x_txt = x_txt_ref[...].astype(jnp.bfloat16)

    # --- features = cat((txt, num), 1); dropout = identity (eval); logits = fc(features).
    #     Concat is realized as two dots sharing the f32 accumulator (no VMEM staging). ---
    logits = (jnp.dot(x_txt, wfc_txt_ref[...], preferred_element_type=jnp.float32)
              + jnp.dot(h.astype(jnp.bfloat16), wfc_num_ref[...],
                        preferred_element_type=jnp.float32)
              + bfc_ref[...])
    out_ref[...] = logits.astype(out_ref.dtype)           # bf16, lane-dense writeback


def prepare_params(params, d_txt, d_num, hidden, n_classes):
    """Zero-pad the lane (output) dims to 128, keep true K dims, cast matmul weights to
    bf16, keep biases in f32. The fc weight stays split into its [txt | num] halves so the
    kernel can use two dots instead of a VMEM concat."""
    hid_p = _round_up(hidden, LANE)
    c_p = _round_up(n_classes, LANE)

    w1 = jnp.zeros((d_num, hid_p), jnp.float32).at[:, :hidden].set(params["w1"])
    b1 = jnp.zeros((1, hid_p), jnp.float32).at[:, :hidden].set(params["b1"])
    w2 = jnp.zeros((hid_p, hid_p), jnp.float32).at[:hidden, :hidden].set(params["w2"])
    b2 = jnp.zeros((1, hid_p), jnp.float32).at[:, :hidden].set(params["b2"])
    wfc_txt = jnp.zeros((d_txt, c_p), jnp.float32).at[:, :n_classes].set(params["wfc_txt"])
    wfc_num = jnp.zeros((hid_p, c_p), jnp.float32).at[:hidden, :n_classes].set(params["wfc_num"])
    bfc = jnp.zeros((1, c_p), jnp.float32).at[:, :n_classes].set(params["bfc"])

    return {
        "w1": w1.astype(jnp.bfloat16), "b1": b1,
        "w2": w2.astype(jnp.bfloat16), "b2": b2,
        "wfc_txt": wfc_txt.astype(jnp.bfloat16),
        "wfc_num": wfc_num.astype(jnp.bfloat16),
        "bfc": bfc,
    }


@functools.partial(jax.jit, static_argnames=("n_classes", "tile_b"))
def deepseqnet_forward(x_txt, x_num, padded_params, *, n_classes, tile_b=1024):
    B, d_txt = x_txt.shape
    d_num = x_num.shape[1]
    # All padded sizes come from static array shapes (no traced ints used as shapes).
    hid_p = padded_params["w1"].shape[1]
    c_p = padded_params["bfc"].shape[1]

    # Batch tiling: cap tile_b so large batches get >= 2 grid steps (both v7x TCs busy);
    # sublane-align the tile; a ragged last block is handled by Pallas masking.
    tile_b = min(tile_b, max(8, _round_up(pl.cdiv(B, 2), 16)))
    n_tiles = pl.cdiv(B, tile_b)

    batch_spec = lambda shape: pl.BlockSpec(shape, lambda i: (i, 0))
    resident_spec = lambda shape: pl.BlockSpec(shape, lambda i: (0, 0))

    out_padded = pl.pallas_call(
        deepseqnet_kernel,
        out_shape=jax.ShapeDtypeStruct((B, c_p), jnp.bfloat16),
        grid=(n_tiles,),
        in_specs=[
            batch_spec((tile_b, d_txt)),        # x_txt tile (f32, true feature width)
            batch_spec((tile_b, d_num)),        # x_num tile (f32, true feature width)
            resident_spec((d_num, hid_p)),      # w1 (VMEM-resident across grid steps)
            resident_spec((1, hid_p)),          # b1
            resident_spec((hid_p, hid_p)),      # w2
            resident_spec((1, hid_p)),          # b2
            resident_spec((d_txt, c_p)),        # fc weight, txt half
            resident_spec((hid_p, c_p)),        # fc weight, num half
            resident_spec((1, c_p)),            # fc bias
        ],
        out_specs=batch_spec((tile_b, c_p)),    # lane-dense (c_p = 128) bf16 output
        compiler_params=pltpu.CompilerParams(
            dimension_semantics=("parallel",),
        ),
    )(x_txt, x_num,
      padded_params["w1"], padded_params["b1"],
      padded_params["w2"], padded_params["b2"],
      padded_params["wfc_txt"], padded_params["wfc_num"], padded_params["bfc"])

    return out_padded[:, :n_classes].astype(jnp.float32)


def make_params(key, d_txt, d_num, hidden, n_classes):
    ks = jax.random.split(key, 7)
    scale = 0.1
    return {
        "w1": scale * jax.random.normal(ks[0], (d_num, hidden), jnp.float32),
        "b1": scale * jax.random.normal(ks[1], (1, hidden), jnp.float32),
        "w2": scale * jax.random.normal(ks[2], (hidden, hidden), jnp.float32),
        "b2": scale * jax.random.normal(ks[3], (1, hidden), jnp.float32),
        # fc weight over concat([txt, num]) split into the txt part and the num part
        "wfc_txt": scale * jax.random.normal(ks[4], (d_txt, n_classes), jnp.float32),
        "wfc_num": scale * jax.random.normal(ks[5], (hidden, n_classes), jnp.float32),
        "bfc": scale * jax.random.normal(ks[6], (1, n_classes), jnp.float32),
    }


def reference_forward(x_txt, x_num, p):
    """Pure-JAX f32 reference mirroring the PyTorch forward (eval mode)."""
    h = jnp.maximum(x_num @ p["w1"] + p["b1"], 0.0)
    h = jnp.maximum(h @ p["w2"] + p["b2"], 0.0)
    feats = jnp.concatenate([x_txt, h], axis=1)
    wfc = jnp.concatenate([p["wfc_txt"], p["wfc_num"]], axis=0)
    return feats @ wfc + p["bfc"]


if __name__ == "__main__":
    B, D_TXT, D_NUM, HIDDEN, N_CLASSES = 2, 32, 16, 32, 4

    key = jax.random.PRNGKey(0)
    k_txt, k_num, k_par = jax.random.split(key, 3)

    x_txt = jax.random.normal(k_txt, (B, D_TXT), jnp.float32)   # text features (txt net abstract)
    x_num = jax.random.normal(k_num, (B, D_NUM), jnp.float32)   # numeric features
    params = make_params(k_par, D_TXT, D_NUM, HIDDEN, N_CLASSES)
    padded = prepare_params(params, D_TXT, D_NUM, HIDDEN, N_CLASSES)

    logits = deepseqnet_forward(x_txt, x_num, padded, n_classes=N_CLASSES)
    jax.block_until_ready(logits)

    ref = reference_forward(x_txt, x_num, params)
    assert logits.shape == (B, N_CLASSES)
    # bf16 matmul inputs / bf16 writeback vs f32 reference -> tolerance, not bit-exact.
    assert jnp.allclose(logits, ref, atol=3e-2, rtol=3e-2), (
        f"max abs diff {jnp.max(jnp.abs(logits - ref))}")

    print("KERNEL_OK")
</pallas_src>

<mosaic_0001>
module attributes {stable_mosaic.version = 11 : i64} {
  func.func @deepseqnet_kernel(%arg0: i32, %arg1: memref<16x32xf32, #tpu.memory_space<vmem>>, %arg2: memref<16x16xf32, #tpu.memory_space<vmem>>, %arg3: memref<16x128xbf16, #tpu.memory_space<vmem>>, %arg4: memref<1x128xf32, #tpu.memory_space<vmem>>, %arg5: memref<128x128xbf16, #tpu.memory_space<vmem>>, %arg6: memref<1x128xf32, #tpu.memory_space<vmem>>, %arg7: memref<32x128xbf16, #tpu.memory_space<vmem>>, %arg8: memref<128x128xbf16, #tpu.memory_space<vmem>>, %arg9: memref<1x128xf32, #tpu.memory_space<vmem>>, %arg10: memref<16x128xbf16, #tpu.memory_space<vmem>>) attributes {dimension_semantics = [#tpu.dimension_semantics<parallel>], iteration_bounds = array<i64: 1>, scalar_prefetch = 0 : i64, scratch_operands = 0 : i64, tpu.core_type = #tpu.core_type<tc>, window_params = [{transform_indices = @transform_0, window_bounds = array<i64: 16, 32>}, {transform_indices = @transform_1, window_bounds = array<i64: 16, 16>}, {pipeline_mode = #tpu.pipeline_mode<synchronous>, transform_indices = @transform_2, window_bounds = array<i64: 16, 128>}, {pipeline_mode = #tpu.pipeline_mode<synchronous>, transform_indices = @transform_3, window_bounds = array<i64: 1, 128>}, {pipeline_mode = #tpu.pipeline_mode<synchronous>, transform_indices = @transform_4, window_bounds = array<i64: 128, 128>}, {pipeline_mode = #tpu.pipeline_mode<synchronous>, transform_indices = @transform_5, window_bounds = array<i64: 1, 128>}, {pipeline_mode = #tpu.pipeline_mode<synchronous>, transform_indices = @transform_6, window_bounds = array<i64: 32, 128>}, {pipeline_mode = #tpu.pipeline_mode<synchronous>, transform_indices = @transform_7, window_bounds = array<i64: 128, 128>}, {pipeline_mode = #tpu.pipeline_mode<synchronous>, transform_indices = @transform_8, window_bounds = array<i64: 1, 128>}, {transform_indices = @transform_9, window_bounds = array<i64: 16, 128>}]} {
    %c0 = arith.constant 0 : index
    %c0_0 = arith.constant 0 : index
    %0 = vector.load %arg2[%c0, %c0_0] : memref<16x16xf32, #tpu.memory_space<vmem>>, vector<16x16xf32>
    %1 = arith.truncf %0 : vector<16x16xf32> to vector<16x16xbf16>
    %c0_1 = arith.constant 0 : index
    %c0_2 = arith.constant 0 : index
    %2 = vector.load %arg3[%c0_1, %c0_2] : memref<16x128xbf16, #tpu.memory_space<vmem>>, vector<16x128xbf16>
    %cst = arith.constant dense<0.000000e+00> : vector<16x128xf32>
    %3 = tpu.matmul %1, %2, %cst {dimension_numbers = #tpu.dot_dimension_numbers<[1], [0], [0], [1], [0, 0, 1, 1], [], []>} : vector<16x16xbf16>, vector<16x128xbf16>, vector<16x128xf32> -> vector<16x128xf32>
    %c0_3 = arith.constant 0 : index
    %c0_4 = arith.constant 0 : index
    %4 = vector.load %arg4[%c0_3, %c0_4] : memref<1x128xf32, #tpu.memory_space<vmem>>, vector<1x128xf32>
    %5 = vector.broadcast %4 : vector<1x128xf32> to vector<16x128xf32>
    %6 = arith.addf %3, %5 : vector<16x128xf32>
    %cst_5 = arith.constant 0.000000e+00 : f32
    %7 = vector.broadcast %cst_5 : f32 to vector<16x128xf32>
    %8 = arith.maximumf %6, %7 : vector<16x128xf32>
    %9 = arith.truncf %8 : vector<16x128xf32> to vector<16x128xbf16>
    %c0_6 = arith.constant 0 : index
    %c0_7 = arith.constant 0 : index
    %10 = vector.load %arg5[%c0_6, %c0_7] : memref<128x128xbf16, #tpu.memory_space<vmem>>, vector<128x128xbf16>
    %cst_8 = arith.constant dense<0.000000e+00> : vector<16x128xf32>
    %11 = tpu.matmul %9, %10, %cst_8 {dimension_numbers = #tpu.dot_dimension_numbers<[1], [0], [0], [1], [0, 0, 1, 1], [], []>} : vector<16x128xbf16>, vector<128x128xbf16>, vector<16x128xf32> -> vector<16x128xf32>
    %c0_9 = arith.constant 0 : index
    %c0_10 = arith.constant 0 : index
    %12 = vector.load %arg6[%c0_9, %c0_10] : memref<1x128xf32, #tpu.memory_space<vmem>>, vector<1x128xf32>
    %13 = vector.broadcast %12 : vector<1x128xf32> to vector<16x128xf32>
    %14 = arith.addf %11, %13 : vector<16x128xf32>
    %cst_11 = arith.constant 0.000000e+00 : f32
    %15 = vector.broadcast %cst_11 : f32 to vector<16x128xf32>
    %16 = arith.maximumf %14, %15 : vector<16x128xf32>
    %c0_12 = arith.constant 0 : index
    %c0_13 = arith.constant 0 : index
    %17 = vector.load %arg1[%c0_12, %c0_13] : memref<16x32xf32, #tpu.memory_space<vmem>>, vector<16x32xf32>
    %18 = arith.truncf %17 : vector<16x32xf32> to vector<16x32xbf16>
    %c0_14 = arith.constant 0 : index
    %c0_15 = arith.constant 0 : index
    %19 = vector.load %arg7[%c0_14, %c0_15] : memref<32x128xbf16, #tpu.memory_space<vmem>>, vector<32x128xbf16>
    %cst_16 = arith.constant dense<0.000000e+00> : vector<16x128xf32>
    %20 = tpu.matmul %18, %19, %cst_16 {dimension_numbers = #tpu.dot_dimension_numbers<[1], [0], [0], [1], [0, 0, 1, 1], [], []>} : vector<16x32xbf16>, vector<32x128xbf16>, vector<16x128xf32> -> vector<16x128xf32>
    %21 = arith.truncf %16 : vector<16x128xf32> to vector<16x128xbf16>
    %c0_17 = arith.constant 0 : index
    %c0_18 = arith.constant 0 : index
    %22 = vector.load %arg8[%c0_17, %c0_18] : memref<128x128xbf16, #tpu.memory_space<vmem>>, vector<128x128xbf16>
    %cst_19 = arith.constant dense<0.000000e+00> : vector<16x128xf32>
    %23 = tpu.matmul %21, %22, %cst_19 {dimension_numbers = #tpu.dot_dimension_numbers<[1], [0], [0], [1], [0, 0, 1, 1], [], []>} : vector<16x128xbf16>, vector<128x128xbf16>, vector<16x128xf32> -> vector<16x128xf32>
    %24 = arith.addf %20, %23 : vector<16x128xf32>
    %c0_20 = arith.constant 0 : index
    %c0_21 = arith.constant 0 : index
    %25 = vector.load %arg9[%c0_20, %c0_21] : memref<1x128xf32, #tpu.memory_space<vmem>>, vector<1x128xf32>
    %26 = vector.broadcast %25 : vector<1x128xf32> to vector<16x128xf32>
    %27 = arith.addf %24, %26 : vector<16x128xf32>
    %28 = arith.truncf %27 : vector<16x128xf32> to vector<16x128xbf16>
    %c0_22 = arith.constant 0 : index
    %c0_23 = arith.constant 0 : index
    %29 = vector.load %arg10[%c0_22, %c0_23] : memref<16x128xbf16, #tpu.memory_space<vmem>>, vector<16x128xbf16>
    tpu.vector_store %arg10[%c0_22, %c0_23], %28 {strides = array<i32>} : memref<16x128xbf16, #tpu.memory_space<vmem>>, vector<16x128xbf16>,
    return
  }
  func.func @transform_0(%arg0: i32) -> (i32, i32) {
    %c0_i32 = arith.constant 0 : i32
    %c0_i32_0 = arith.constant 0 : i32
    return %arg0, %c0_i32 : i32, i32
  }
  func.func @transform_1(%arg0: i32) -> (i32, i32) {
    %c0_i32 = arith.constant 0 : i32
    %c0_i32_0 = arith.constant 0 : i32
    return %arg0, %c0_i32 : i32, i32
  }
  func.func @transform_2(%arg0: i32) -> (i32, i32) {
    %c0_i32 = arith.constant 0 : i32
    %c0_i32_0 = arith.constant 0 : i32
    %c0_i32_1 = arith.constant 0 : i32
    return %c0_i32, %c0_i32_0 : i32, i32
  }
  func.func @transform_3(%arg0: i32) -> (i32, i32) {
    %c0_i32 = arith.constant 0 : i32
    %c0_i32_0 = arith.constant 0 : i32
    %c0_i32_1 = arith.constant 0 : i32
    return %c0_i32, %c0_i32_0 : i32, i32
  }
  func.func @transform_4(%arg0: i32) -> (i32, i32) {
    %c0_i32 = arith.constant 0 : i32
    %c0_i32_0 = arith.constant 0 : i32
    %c0_i32_1 = arith.constant 0 : i32
    return %c0_i32, %c0_i32_0 : i32, i32
  }
  func.func @transform_5(%arg0: i32) -> (i32, i32) {
    %c0_i32 = arith.constant 0 : i32
    %c0_i32_0 = arith.constant 0 : i32
    %c0_i32_1 = arith.constant 0 : i32
    return %c0_i32, %c0_i32_0 : i32, i32
  }
  func.func @transform_6(%arg0: i32) -> (i32, i32) {
    %c0_i32 = arith.constant 0 : i32
    %c0_i32_0 = arith.constant 0 : i32
    %c0_i32_1 = arith.constant 0 : i32
    return %c0_i32, %c0_i32_0 : i32, i32
  }
  func.func @transform_7(%arg0: i32) -> (i32, i32) {
    %c0_i32 = arith.constant 0 : i32
    %c0_i32_0 = arith.constant 0 : i32
    %c0_i32_1 = arith.constant 0 : i32
    return %c0_i32, %c0_i32_0 : i32, i32
  }
  func.func @transform_8(%arg0: i32) -> (i32, i32) {
    %c0_i32 = arith.constant 0 : i32
    %c0_i32_0 = arith.constant 0 : i32
    %c0_i32_1 = arith.constant 0 : i32
    return %c0_i32, %c0_i32_0 : i32, i32
  }
  func.func @transform_9(%arg0: i32) -> (i32, i32) {
    %c0_i32 = arith.constant 0 : i32
    %c0_i32_0 = arith.constant 0 : i32
    return %arg0, %c0_i32 : i32, i32
  }
}

</mosaic_0001>

<bundles_post_ra>
// kernel: deepseqnet_forward.1
= control target key start
LH: loop header
LB: loop body
LE: loop exit
PB: predicated region body
PF: predicated region fallthrough
CT: control target
= control target key end

     0   :  { %14 = vsyncpa [#allocation3], 0  ;;  %s902_s0 = inlined_call_operand.hbm [shape: f32[2,32], index: 0, kind: input, shape index: {}]   ;;  %s903_s1 = inlined_call_operand.vmem [shape: f32[2,16], index: 1, kind: input, shape index: {}]   ;;  %s904_s2 = inlined_call_operand.vmem [shape: bf16[16,128], index: 2, kind: input, shape index: {}]   ;;  %s905_s3 = inlined_call_operand.vmem [shape: f32[1,128], index: 3, kind: input, shape index: {}]   ;;  %s906_s4 = inlined_call_operand.hbm [shape: bf16[128,128], index: 4, kind: input, shape index: {}]   ;;  %s907_s5 = inlined_call_operand.vmem [shape: f32[1,128], index: 5, kind: input, shape index: {}]   ;;  %s908_s6 = inlined_call_operand.vmem [shape: bf16[32,128], index: 6, kind: input, shape index: {}]   ;;  %s909_s7 = inlined_call_operand.hbm [shape: bf16[128,128], index: 7, kind: input, shape index: {}]   ;;  %s910_s8 = inlined_call_operand.vmem [shape: f32[1,128], index: 8, kind: input, shape index: {}]   ;;  %s911_s9 = inlined_call_operand.vmem [shape: bf16[2,128], index: 9, kind: output, shape index: {}]  }
   0x1   :  { %15 = vsyncpa [#allocation5], 0 }
   0x2   :  { %20 = vsyncadd [#allocation3], 224  ;;  %s746_s30 = smov [#allocation4]   ;;  %s676_s13 = scalar_lea.hbm %s906_s4, 1024 }
   0x3   :  { %s39_s10 = sshll.u32 %s746_s30, 4  ;;  %p677_p0 = scmp.ne.s32.totalorder %s906_s4, %s676_s13  ;;  %s40_s10 = int_to_ptr.vmem [resolvable:$true] %s39_s10 }
   0x4   :  { %p680_p1 = scmp.lt.u32.totalorder %s676_s13, %s906_s4 }
   0x6   :  { %p682_p2 = pnand %p680_p1, %p677_p0 }
   0x8   :  { %685 = shalt.err (!%p682_p2)
}
   0x9   :  { %s686_s18 = scalar_lea.vmem %s40_s10, 1024  ;;  %p691_p4 = scmp.lt.s32.totalorder %s40_s10, %s40_s10 }
   0xa   :  { %p687_p3 = scmp.ne.s32.totalorder %s40_s10, %s686_s18  ;;  %p692_p5 = scmp.lt.s32.totalorder %s686_s18, %s686_s18 }
   0xc   :  { %p693_p6 = por %p692_p5, %p691_p4 }
   0xe   :  { %p694_p7 = pnand %p693_p6, %p687_p3 }
  0x10   :  { %697 = shalt.err (!%p694_p7)
}
  0x11   :  { %s747_s19 = smov 64   ;;  %s748_s20 = smov 4  }
  0x12   :  { %45 = dma.hbm_to_vmem [thread:$0]  %s906_s4, 1024, %s40_s10, [#allocation5], %s747_s19, %s747_s19, %s748_s20  }
  0x13   :  { %s749_s23 = smov [#allocation2]   ;;  %s698_s27 = scalar_lea.hbm %s902_s0, 32 }
  0x14   :  { %s21_s24 = sshll.u32 %s749_s23, 4  ;;  %p699_p8 = scmp.ne.s32.totalorder %s902_s0, %s698_s27  ;;  %s22_s24 = int_to_ptr.vmem [resolvable:$true] %s21_s24 }
  0x15   :  { %p702_p9 = scmp.lt.u32.totalorder %s698_s27, %s902_s0 }
  0x17   :  { %p704_p10 = pnand %p702_p9, %p699_p8 }
  0x19   :  { %707 = shalt.err (!%p704_p10)
}
  0x1a   :  { %s708_s12 = scalar_lea.vmem %s22_s24, 32  ;;  %s712_s4 = scalar_lea.vmem %s22_s24, 256 }
  0x1b   :  { %p709_p11 = scmp.ne.s32.totalorder %s22_s24, %s708_s12  ;;  %p713_p12 = scmp.lt.s32.totalorder %s22_s24, %s22_s24 }
  0x1c   :  { %p714_p13 = scmp.lt.s32.totalorder %s712_s4, %s708_s12 }
  0x1e   :  { %p715_p0 = por %p714_p13, %p713_p12 }
  0x20   :  { %p716_p1 = pnand %p715_p0, %p709_p11 }
  0x22   :  { %719 = shalt.err (!%p716_p1)
}
  0x23   :  { %s750_s10 = smov 32   ;;  %s751_s13 = smov 2  }
  0x24   :  { %27 = dma.hbm_to_vmem [thread:$0]  %s902_s0, 32, %s22_s24, [#allocation3], %s750_s10, %s750_s10, %s751_s13  }
  0x25   :  { %s752_s16 = smov [#allocation6]   ;;  %s720_s22 = scalar_lea.hbm %s909_s7, 1024 }
  0x26   :  { %s55_s17 = sshll.u32 %s752_s16, 4  ;;  %p721_p2 = scmp.ne.s32.totalorder %s909_s7, %s720_s22  ;;  %s56_s17 = int_to_ptr.vmem [resolvable:$true] %s55_s17 }
  0x27   :  { %p724_p3 = scmp.lt.u32.totalorder %s720_s22, %s909_s7 }
  0x29   :  { %p726_p4 = pnand %p724_p3, %p721_p2 }
  0x2b   :  { %729 = shalt.err (!%p726_p4)
}
  0x2c   :  { %s730_s28 = scalar_lea.vmem %s56_s17, 1024  ;;  %p735_p6 = scmp.lt.s32.totalorder %s56_s17, %s56_s17 }
  0x2d   :  { %p731_p5 = scmp.ne.s32.totalorder %s56_s17, %s730_s28  ;;  %p736_p7 = scmp.lt.s32.totalorder %s730_s28, %s730_s28 }
  0x2f   :  { %p737_p8 = por %p736_p7, %p735_p6 }
  0x31   :  { %p738_p9 = pnand %p737_p8, %p731_p5 }
  0x33   :  { %741 = shalt.err (!%p738_p9)
}
  0x34   :  { %61 = dma.hbm_to_vmem [thread:$0]  %s909_s7, 1024, %s56_s17, [#allocation5], %s747_s19, %s747_s19, %s748_s20  }
  0x35   :  { %742 = dma.done.wait [#allocation3], 256  }
  0x36   :  { %743 = vsyncadd [#allocation3], 4294967040 }
  0x37   :  { %744 = dma.done.wait [#allocation5], 2048  }
  0x38   :  { %745 = vsyncadd [#allocation5], 4294965248  ;;  %v753_v0 = vmov 0.0   ;;  %vm754_vm0 = vmmov 0   ;;  %v657_v1 = vld [vmem:[%s904_s2] sm:$0xff]   ;;  %v75_v3 = vld [vmem:[%s903_s1 + $0x8] sm:$0xff]  ;;  %v439_v52 = vlaneseq }
  0x39   :  { %593 = vmatprep.subr.bf16.mxu0 %v753_v0  ;;  %595 = vmatprep.mubr.msk.bf16.mxu0 %vm754_vm0, %v753_v0  ;;  %v74_v2 = vld [vmem:[%s903_s1] sm:$0xff]  ;;  %vm92_vm1 = vcmask 130048   ;;  %v658_v5 = vld [vmem:[#allocation4] sm:$0xff]   ;;  %v659_v6 = vld [vmem:[#allocation4 + $0x8] sm:$0xff]   ;;  %vm379_vm2 = vcmask 261120  }
  0x3a   :  { %599 = vmatprep.subr.bf16.mxu1 %v753_v0  ;;  %615 = vmatprep.mubr.msk.bf16.mxu1 %vm754_vm0, %v753_v0  ;;  %v76_v4 = vpack.c.bf16 %v75_v3, %v74_v2  ;;  %v660_v7 = vld [vmem:[#allocation4 + $0x10] sm:$0xff]   ;;  %v661_v8 = vld [vmem:[#allocation4 + $0x18] sm:$0xff]   ;;  %v662_v9 = vld [vmem:[#allocation4 + $0x20] sm:$0xff]   ;;  %v755_v50 = vmov 1966171168   ;;  %v440_v57 = vshrl.u32 %v439_v52, 7 }
  0x3b   :  { %594 = vmatpush3.bf16.msra.mxu0 %v657_v1  ;;  %600 = vmatpush3.bf16.msra.mxu1 %v658_v5  ;;  %v663_v10 = vld [vmem:[#allocation4 + $0x28] sm:$0xff]   ;;  %v664_v11 = vld [vmem:[#allocation4 + $0x30] sm:$0xff]   ;;  %v665_v12 = vld [vmem:[#allocation4 + $0x38] sm:$0xff]   ;;  %v437_v51 = vunpack.c.l.s4 %v755_v50 }
  0x3c   :  { %619 = vmatprep.subr.bf16.mxu0 %v753_v0  ;;  %601 = vmatprep.subr.bf16.mxu1 %v753_v0  ;;  %v666_v13 = vld [vmem:[#allocation6] sm:$0xff]   ;;  %v667_v14 = vld [vmem:[#allocation6 + $0x8] sm:$0xff]   ;;  %v668_v15 = vld [vmem:[#allocation6 + $0x10] sm:$0xff]  }
  0x3d   :  { %v669_v16 = vld [vmem:[#allocation6 + $0x18] sm:$0xff]   ;;  %v670_v17 = vld [vmem:[#allocation6 + $0x20] sm:$0xff]   ;;  %v671_v18 = vld [vmem:[#allocation6 + $0x28] sm:$0xff]   ;;  %v438_v56 = vunpack.c.0.s8 %v437_v51 }
  0x3e   :  { %596 = vmatmul.mubr.msk.bf16.vlgmr.msra.gmra.mrb[0].mxu0 %vm92_vm1, %v76_v4  ;;  %v541_v19 = vld [vmem:[%s905_s3] ss:$0 sm:$0xff]  ;;  %v673_v30 = vld [vmem:[#allocation6 + $0x30] sm:$0xff]   ;;  %v674_v31 = vld [vmem:[%s908_s6 + $0x8] sm:$0xff]  }
  0x3f   :  { %635 = vmatprep.mubr.msk.bf16.mxu0 %vm754_vm0, %v753_v0  ;;  %602 = vmatpush3.bf16.msra.mxu1 %v659_v6  ;;  %v672_v28 = vld [vmem:[%s908_s6] sm:$0xff]   ;;  %v254_v32 = vld [vmem:[#allocation2] sm:$0xff] }
  0x40   :  { %603 = vmatprep.subr.bf16.mxu1 %v753_v0  ;;  %620 = vmatpush3.bf16.msra.mxu0 %v666_v13  ;;  %v255_v33 = vld [vmem:[#allocation2 + $0x8] sm:$0xff] }
  0x41   :  { %621 = vmatprep.subr.bf16.mxu0 %v753_v0  ;;  %v675_v34 = vld [vmem:[#allocation6 + $0x38] sm:$0xff]   ;;  %v256_v35 = vpack.c.bf16 %v255_v33, %v254_v32 }
  0x42   :  { %v544_v36 = vld [vmem:[%s907_s5] ss:$0 sm:$0xff] }
  0x43   :  { %604 = vmatpush3.bf16.msra.mxu1 %v660_v7  ;;  %v564_v58 = vld [vmem:[%s910_s8] ss:$0 sm:$0xff] }
  0x44   :  { %605 = vmatprep.subr.bf16.mxu1 %v753_v0  ;;  %622 = vmatpush3.bf16.msra.mxu0 %v667_v14 }
  0x45   :  { %623 = vmatprep.subr.bf16.mxu0 %v753_v0 }
  0x47   :  { %606 = vmatpush3.bf16.msra.mxu1 %v661_v8 }
  0x48   :  { %607 = vmatprep.subr.bf16.mxu1 %v753_v0  ;;  %624 = vmatpush3.bf16.msra.mxu0 %v668_v15 }
  0x49   :  { %625 = vmatprep.subr.bf16.mxu0 %v753_v0 }
  0x4b   :  { %608 = vmatpush3.bf16.msra.mxu1 %v662_v9 }
  0x4c   :  { %609 = vmatprep.subr.bf16.mxu1 %v753_v0  ;;  %626 = vmatpush3.bf16.msra.mxu0 %v669_v16 }
  0x4d   :  { %627 = vmatprep.subr.bf16.mxu0 %v753_v0 }
  0x4f   :  { %610 = vmatpush3.bf16.msra.mxu1 %v663_v10 }
  0x50   :  { %611 = vmatprep.subr.bf16.mxu1 %v753_v0  ;;  %628 = vmatpush3.bf16.msra.mxu0 %v670_v17 }
  0x51   :  { %629 = vmatprep.subr.bf16.mxu0 %v753_v0 }
  0x53   :  { %612 = vmatpush3.bf16.msra.mxu1 %v664_v11 }
  0x54   :  { %613 = vmatprep.subr.bf16.mxu1 %v753_v0  ;;  %630 = vmatpush3.bf16.msra.mxu0 %v671_v18 }
  0x55   :  { %631 = vmatprep.subr.bf16.mxu0 %v753_v0 }
  0x57   :  { %614 = vmatpush3.bf16.msra.mxu1 %v665_v12 }
  0x58   :  { %639 = vmatprep.subr.bf16.mxu1 %v753_v0  ;;  %632 = vmatpush3.bf16.msra.mxu0 %v673_v30 }
  0x59   :  { %633 = vmatprep.subr.bf16.mxu0 %v753_v0 }
  0x5c   :  { %634 = vmatpush3.bf16.msra.mxu0 %v675_v34 }
 0x111   :  { %v130_v20 = vpop.f32.mrb[0].mxu0 }
 0x112   :  { %v131_v21 = vadd.f32 %v541_v19, %v130_v20  ;;  %v597_v22 = vpop.f32.mrb[1].mxu0 }
 0x113   :  { %v133_v23 = vpop.f32.mrb[2].mxu0 }
 0x114   :  { %v134_v24 = vadd.f32 %v541_v19, %v133_v23  ;;  %v598_v25 = vpop.f32.mrb[3].mxu0  ;;  %v137_v26 = vmax.f32 %v131_v21, 0.0 }
 0x116   :  { %v138_v27 = vmax.f32 %v134_v24, 0.0 }
 0x118   :  { %v139_v29 = vpack.c.bf16 %v138_v27, %v137_v26 }
 0x11a   :  { %616 = vmatmul.mubr.bf16.vlgmr.msra.gmra.mrb[0].mxu1 %v139_v29 }
 0x11b   :  { %640 = vmatpush3.bf16.msra.mxu1 %v672_v28  ;;  %643 = vmatprep.mubr.msk.bf16.mxu1 %vm754_vm0, %v753_v0 }
 0x11c   :  { %641 = vmatprep.subr.bf16.mxu1 %v753_v0  ;;  %v441_v0 = vsub.s32 %v438_v56, %v440_v57 }
 0x11f   :  { %642 = vmatpush3.bf16.msra.mxu1 %v674_v31 }
 0x122   :  { %644 = vmatmul.mubr.msk.bf16.vlgmr.msra.gmra.mrb[4].mxu1 %vm379_vm2, %v256_v35 }
 0x1ed   :  { %v245_v37 = vpop.f32.mrb[0].mxu1 }
 0x1ee   :  { %v246_v38 = vadd.f32 %v544_v36, %v245_v37  ;;  %v617_v39 = vpop.f32.mrb[1].mxu1 }
 0x1ef   :  { %v248_v40 = vpop.f32.mrb[2].mxu1 }
 0x1f0   :  { %v249_v41 = vadd.f32 %v544_v36, %v248_v40  ;;  %v618_v42 = vpop.f32.mrb[3].mxu1  ;;  %v252_v43 = vmax.f32 %v246_v38, 0.0 }
 0x1f2   :  { %v253_v44 = vmax.f32 %v249_v41, 0.0 }
 0x1f4   :  { %v261_v45 = vpack.c.bf16 %v253_v44, %v252_v43 }
 0x1f5   :  { %v417_v46 = vpop.f32.mrb[4].mxu1 }
 0x1f6   :  { %636 = vmatmul.mubr.bf16.vlgmr.msra.gmra.mrb[4].mxu0 %v261_v45  ;;  %v645_v47 = vpop.f32.mrb[5].mxu1 }
 0x1f7   :  { %v420_v48 = vpop.f32.mrb[6].mxu1 }
 0x1f8   :  { %v646_v49 = vpop.f32.mrb[7].mxu1 }
 0x2c9   :  { %v360_v53 = vpop.f32.mrb[4].mxu0 }
 0x2ca   :  { %v418_v54 = vadd.f32 %v417_v46, %v360_v53  ;;  %v637_v55 = vpop.f32.mrb[5].mxu0 }
 0x2cb   :  { %v363_v59 = vpop.f32.mrb[6].mxu0 }
 0x2cc   :  { %v421_v60 = vadd.f32 %v420_v48, %v363_v59  ;;  %v638_v61 = vpop.f32.mrb[7].mxu0  ;;  %v431_v62 = vadd.f32 %v564_v58, %v418_v54 }
 0x2ce   :  { %v432_v63 = vadd.f32 %v564_v58, %v421_v60 }
 0x2d0   :  { %v433_v1 = vpack.c.bf16 %v432_v63, %v431_v62 }
 0x2d2   :  { %v442_v2 = vrot.slane %v433_v1, %v441_v0 }
 0x2d4   :  { %566 = vst.sshfl [vmem:[#allocation7] sm:$0x1 pattern:$0x73625140] %v442_v2 }
 0x2db   :  { %v517_v3 = vld [vmem:[#allocation7] sm:$0x1] }
 0x2dc   :  { %518 = vst [vmem:[%s911_s9] sm:$0x1] %v517_v3 }
 0x2dd   :  { %535 = vsyncpa [#allocation3], 1 }
 0x2de   :  { %536 = vsyncpa [#allocation5], 1 }

</bundles_post_ra>
